<compile_context>
chip_gen: v7x
topology: tpu7x:2x2x1
jax: 0.10.0
libtpu: 0.0.40
codegen_flags: <defaults>
</compile_context>

<pallas_src>
import functools

import jax
import jax.numpy as jnp
from jax.experimental import pallas as pl
from jax.experimental.pallas import tpu as pltpu


# ----------------------------------------------------------------------------- kernel


def _attention_kernel(x_ref, hproj_ref, wxt_ref, v_ref, out_ref, *, seq_len, ew_dtype):
    """One grid step == TB batch elements.

    x_ref     : [TB, Sp, H]  GRU outputs for this batch slab (Sp = S padded to mult. of 8)
    hproj_ref : [TB, H]      h_last @ W[:, H:].T  (precomputed in the wrapper, f32)
    wxt_ref   : [H, H]       W[:, :H].T  (acts on x; grid-invariant, single-buffered)
    v_ref     : [1, H]       scoring vector V     (grid-invariant, single-buffered)
    out_ref   : [TB, Sp]     softmax attention weights (cols >= seq_len are padding)
    """
    tb, s, h = x_ref.shape

    # tanh(W @ cat(x, hj)) == tanh(x @ Wx.T + h @ Wh.T); the h-part is precomputed.
    # Fold batch and sequence dims into one big MXU contraction: [TB*Sp, H] @ [H, H].
    # Sp is a multiple of 8 so this reshape is a pure layout no-op.
    x2d = x_ref[...].reshape(tb * s, h)
    proj = jnp.dot(x2d, wxt_ref[...], preferred_element_type=jnp.float32)      # [TB*Sp, H] f32
    proj = proj.reshape(tb, s, h) + hproj_ref[...][:, None, :]                 # hproj is f32

    # Elementwise phase (tanh on the EUP, multiply on the VPU). ew_dtype is bf16 only when
    # the inputs are bf16 and the chip has native bf16 VPU/EUP (v6e/v7x); f32 otherwise.
    t = jnp.tanh(proj.astype(ew_dtype))                                        # [TB, Sp, H]
    v = v_ref[...].astype(ew_dtype).reshape(1, 1, h)
    e = jnp.sum(t * v, axis=-1, dtype=jnp.float32)                             # [TB, Sp] f32

    # Mask padded sequence positions out of the softmax (static no-op when Sp == S).
    if s != seq_len:
        col = jax.lax.broadcasted_iota(jnp.int32, (tb, s), 1)
        e = jnp.where(col < seq_len, e, -jnp.inf)

    # softmax over the sequence axis (dim=1 in the torch module); exact normalization.
    e_max = jnp.max(e, axis=-1, keepdims=True)
    p = jnp.exp(e - e_max)
    denom = jnp.sum(p, axis=-1, keepdims=True)
    inv = pl.reciprocal(denom)                       # exact; denom is a tiny [TB, 1] tensor
    out_ref[...] = (p * inv).astype(out_ref.dtype)


# ----------------------------------------------------------------------------- sizing helpers


def _round_up(n, m):
    return ((n + m - 1) // m) * m


def _vmem_limit_bytes():
    """Generation-aware scoped-VMEM limit: ~3/4 of physical per-core VMEM, capped at 96 MiB.
    -> ~48 MiB on v7x (64 MiB physical), ~96 MiB on v5e/v6e (128 MiB physical)."""
    cap = None
    try:
        cap = getattr(pltpu.get_tpu_info(), "vmem_capacity_bytes", None)
    except Exception:
        cap = None
    if not cap:
        cap = 64 * 1024 * 1024  # conservative default = v7x physical per-core VMEM
    return int(min(cap * 3 // 4, 96 * 1024 * 1024))


def _choose_batch_tile(B, S, H, x_itemsize, ew_itemsize, vmem_limit_bytes):
    """Pick TB so the FULL per-step VMEM footprint (double-buffered x slab + f32 proj +
    elementwise tanh intermediate + h_proj/out buffers + single-buffered weights) fits
    comfortably inside the scoped limit. Lane (128) / sublane (8) padding is included so
    small H (e.g. 32) does not under-count by 4x."""
    Sp = _round_up(S, 8)
    Hp = max(_round_up(H, 128), 128)        # lane padding of the hidden dim
    Sp_lane = max(_round_up(S, 128), 128)   # e/p/out blocks carry S on the lane axis

    # Grid-invariant VMEM (single-buffered Wx^T + V) + slack for compiler-internal scratch.
    fixed = Hp * Hp * x_itemsize + 8 * Hp * x_itemsize + (2 << 20)

    # Per-batch-row VMEM:
    #   x (double-buffered) + proj (f32) + tanh intermediate (ew dtype)
    #   + h_proj (f32, double-buffered) + out (double-buffered) + e/p f32 temps
    per_row = (Sp * Hp * (2 * x_itemsize + 4 + ew_itemsize)
               + 2 * Hp * 4
               + (2 * x_itemsize + 2 * 4) * Sp_lane)

    budget = int(vmem_limit_bytes * 0.75)   # headroom below the scoped limit
    tb_cap = max(1, (budget - fixed) // per_row)

    tb = min(B, tb_cap)
    if tb < B:
        # When actually tiling the batch, keep the sublane dim of the 2-D h_proj / out
        # blocks 8-aligned (BlockSpec (8,128) rule).
        tb = max(8, (tb // 8) * 8)

    # Megacore: v7x has 2 TensorCores sharing the grid axis. If a single tile would cover
    # the whole batch but each half-slab still moves >= ~2 MiB of x (per-step overhead
    # stays amortized), split in two. Harmless (one extra 0.35 us step) on 1-TC chips.
    if tb >= B and B >= 16:
        half = _round_up((B + 1) // 2, 8)
        if half < B and half * S * H * x_itemsize >= (2 << 20):
            tb = half

    return max(int(tb), 1)


def _default_elementwise_dtype(x_dtype):
    """bf16 tanh / V-score only when the data is already bf16 (no extra rounding vs the
    reference) and the chip has a native bf16 VPU/EUP (v6e / v7x; not v2-v5)."""
    if jnp.dtype(x_dtype) != jnp.dtype(jnp.bfloat16):
        return jnp.float32
    try:
        kind = jax.devices()[0].device_kind.lower()
    except Exception:
        kind = ""
    if any(g in kind for g in ("v2", "v3", "v4", "v5")):
        return jnp.float32
    return jnp.bfloat16


# ----------------------------------------------------------------------------- wrapper


def attention_forward(x, hj, W, V, elementwise_dtype=None):
    """
    x  : [B, S, H]   gru layer output
    hj : [L, B, H]   previous hidden state (n_layers first, GRU convention)
    W  : [H, 2H]     nn.Linear(2H, H, bias=False).weight
    V  : [H]         scoring vector parameter
    returns att_weights: [B, S]
    """
    B, S, H = x.shape
    ew_dtype = elementwise_dtype or _default_elementwise_dtype(x.dtype)

    # ---- glue (plain JAX) ----
    h_last = hj[-1]                                            # [B, H]  (== hj.permute(1,0,2)[:, -1, :])
    # Hoisted hidden-state projection: one [B,H] @ [H,H] matmul instead of B degenerate
    # M=1 matmuls inside the kernel. Kept in f32 (no bf16 round-trip before the kernel).
    h_proj = jnp.dot(h_last, W[:, H:].T, preferred_element_type=jnp.float32)   # [B, H] f32
    wxt = W[:, :H].T.astype(x.dtype)                           # [H, H] acts on x
    v_row = V.reshape(1, H)                                    # [1, H]

    vmem_limit = _vmem_limit_bytes()
    TB = _choose_batch_tile(B, S, H, x.dtype.itemsize, jnp.dtype(ew_dtype).itemsize,
                            vmem_limit)
    n_tiles = pl.cdiv(B, TB)
    Bp = n_tiles * TB
    Sp = _round_up(S, 8)                                       # sublane-align the seq axis
    if Bp != B or Sp != S:
        x = jnp.pad(x, ((0, Bp - B), (0, Sp - S), (0, 0)))
        h_proj = jnp.pad(h_proj, ((0, Bp - B), (0, 0)))

    kernel = functools.partial(_attention_kernel, seq_len=S, ew_dtype=ew_dtype)

    # Advisory cost for XLA's scheduler around the custom call.
    cost = pl.CostEstimate(
        flops=2 * Bp * Sp * H * H + 2 * Bp * Sp * H,           # x-projection matmul + V-score
        transcendentals=Bp * Sp * H + Bp * Sp,                 # tanh + exp
        bytes_accessed=(Bp * Sp * H * x.dtype.itemsize         # x stream
                        + Bp * H * 4                           # h_proj
                        + H * H * wxt.dtype.itemsize           # Wx^T
                        + H * v_row.dtype.itemsize             # V
                        + Bp * Sp * x.dtype.itemsize),         # out
    )

    def _build_call(single_buffer_weights):
        if single_buffer_weights:
            # Grid-invariant inputs: no re-DMA needed, so drop the second VMEM buffer.
            w_spec = pl.BlockSpec((H, H), lambda b: (0, 0), pipeline_mode=pl.Buffered(1))
            v_spec = pl.BlockSpec((1, H), lambda b: (0, 0), pipeline_mode=pl.Buffered(1))
        else:
            w_spec = pl.BlockSpec((H, H), lambda b: (0, 0))
            v_spec = pl.BlockSpec((1, H), lambda b: (0, 0))
        return pl.pallas_call(
            kernel,
            out_shape=jax.ShapeDtypeStruct((Bp, Sp), x.dtype),
            grid_spec=pltpu.PrefetchScalarGridSpec(
                num_scalar_prefetch=0,
                grid=(n_tiles,),
                in_specs=[
                    pl.BlockSpec((TB, Sp, H), lambda b: (b, 0, 0)),  # x slab per step
                    pl.BlockSpec((TB, H), lambda b: (b, 0)),         # hoisted h projection (f32)
                    w_spec,                                          # Wx.T (grid-invariant)
                    v_spec,                                          # V    (grid-invariant)
                ],
                out_specs=pl.BlockSpec((TB, Sp), lambda b: (b, 0)),  # lane-dense [TB, Sp] slab
            ),
            compiler_params=pltpu.CompilerParams(
                dimension_semantics=("parallel",),   # batch-tile axis -> both TCs on v7x
                vmem_limit_bytes=vmem_limit,         # generation-aware, matches the tile budget
            ),
            cost_estimate=cost,
        )

    try:
        out = _build_call(True)(x, h_proj, wxt, v_row)
    except Exception:
        # Fallback: default double-buffering of the (small, grid-invariant) weights.
        out = _build_call(False)(x, h_proj, wxt, v_row)
    return out[:B, :S]


# ----------------------------------------------------------------------------- reference


def attention_reference(x, hj, W, V):
    """Pure-JAX reference mirroring the PyTorch forward."""
    B, S, H = x.shape
    h_last = hj[-1]                                        # [B, H]
    h_rep = jnp.broadcast_to(h_last[:, None, :], (B, S, H))
    cat = jnp.concatenate([x, h_rep], axis=2)              # [B, S, 2H]
    t = jnp.tanh(jnp.einsum("bsk,hk->bsh", cat, W))        # Linear(2H->H, no bias)
    e = jnp.einsum("h,bsh->bs", V, t)                      # bmm(V, t.T).squeeze(1)
    e = e - jnp.max(e, axis=1, keepdims=True)
    p = jnp.exp(e)
    return p / jnp.sum(p, axis=1, keepdims=True)


# ----------------------------------------------------------------------------- main


if __name__ == "__main__":
    hidden_dim = 32
    batch = 2
    seq_len = 8
    n_layers = 2

    key = jax.random.PRNGKey(0)
    kx, kh, kw, kv = jax.random.split(key, 4)

    x = jax.random.normal(kx, (batch, seq_len, hidden_dim), dtype=jnp.float32)
    hj = jax.random.normal(kh, (n_layers, batch, hidden_dim), dtype=jnp.float32)

    # nn.Linear(2H, H, bias=False): weight [H, 2H], uniform bound 1/sqrt(2H)
    bound = 1.0 / jnp.sqrt(2.0 * hidden_dim)
    W = jax.random.uniform(kw, (hidden_dim, 2 * hidden_dim),
                           minval=-bound, maxval=bound, dtype=jnp.float32)
    # nn.Parameter(torch.rand(hidden_dim)): uniform [0, 1)
    V = jax.random.uniform(kv, (hidden_dim,), dtype=jnp.float32)

    out = attention_forward(x, hj, W, V)
    out = jax.block_until_ready(out)
    ref = attention_reference(x, hj, W, V)

    assert out.shape == (batch, seq_len)
    assert jnp.allclose(out, ref, atol=1e-4, rtol=1e-4), "Pallas kernel mismatch vs reference"
    assert jnp.allclose(jnp.sum(out, axis=1), 1.0, atol=1e-5), "softmax rows must sum to 1"

    # Second check: non-8-aligned seq_len exercises the S-padding + softmax masking path.
    b2, s2 = 10, 13
    x2 = jax.random.normal(jax.random.PRNGKey(1), (b2, s2, hidden_dim), dtype=jnp.float32)
    hj2 = jax.random.normal(jax.random.PRNGKey(2), (n_layers, b2, hidden_dim), dtype=jnp.float32)
    out2 = jax.block_until_ready(attention_forward(x2, hj2, W, V))
    ref2 = attention_reference(x2, hj2, W, V)
    assert out2.shape == (b2, s2)
    assert jnp.allclose(out2, ref2, atol=1e-4, rtol=1e-4), "padded-S kernel mismatch vs reference"
    assert jnp.allclose(jnp.sum(out2, axis=1), 1.0, atol=1e-5), "softmax rows must sum to 1"

    print("KERNEL_OK")
</pallas_src>

<mosaic_0001>
module attributes {stable_mosaic.version = 11 : i64} {
  func.func @_attention_kernel(%arg0: i32, %arg1: memref<2x8x32xf32, #tpu.memory_space<vmem>>, %arg2: memref<2x32xf32, #tpu.memory_space<vmem>>, %arg3: memref<32x32xf32, #tpu.memory_space<vmem>>, %arg4: memref<1x32xf32, #tpu.memory_space<vmem>>, %arg5: memref<2x8xf32, #tpu.memory_space<vmem>>) attributes {dimension_semantics = [#tpu.dimension_semantics<parallel>], iteration_bounds = array<i64: 1>, scalar_prefetch = 0 : i64, scratch_operands = 0 : i64, tpu.core_type = #tpu.core_type<tc>, window_params = [{transform_indices = @transform_0, window_bounds = array<i64: 2, 8, 32>}, {transform_indices = @transform_1, window_bounds = array<i64: 2, 32>}, {pipeline_mode = #tpu.pipeline_mode<synchronous>, transform_indices = @transform_2, window_bounds = array<i64: 32, 32>}, {pipeline_mode = #tpu.pipeline_mode<synchronous>, transform_indices = @transform_3, window_bounds = array<i64: 1, 32>}, {transform_indices = @transform_4, window_bounds = array<i64: 2, 8>}]} {
    %c0 = arith.constant 0 : index
    %c0_0 = arith.constant 0 : index
    %c0_1 = arith.constant 0 : index
    %0 = vector.load %arg1[%c0, %c0_0, %c0_1] : memref<2x8x32xf32, #tpu.memory_space<vmem>>, vector<2x8x32xf32>
    %1 = vector.shape_cast %0 : vector<2x8x32xf32> to vector<16x32xf32>
    %c0_2 = arith.constant 0 : index
    %c0_3 = arith.constant 0 : index
    %2 = vector.load %arg3[%c0_2, %c0_3] : memref<32x32xf32, #tpu.memory_space<vmem>>, vector<32x32xf32>
    %cst = arith.constant dense<0.000000e+00> : vector<16x32xf32>
    %3 = tpu.matmul %1, %2, %cst {dimension_numbers = #tpu.dot_dimension_numbers<[1], [0], [0], [1], [0, 0, 1, 1], [], []>} : vector<16x32xf32>, vector<32x32xf32>, vector<16x32xf32> -> vector<16x32xf32>
    %4 = vector.shape_cast %3 : vector<16x32xf32> to vector<2x8x32xf32>
    %c0_4 = arith.constant 0 : index
    %c0_5 = arith.constant 0 : index
    %5 = vector.load %arg2[%c0_4, %c0_5] : memref<2x32xf32, #tpu.memory_space<vmem>>, vector<2x32xf32>
    %6 = vector.shape_cast %5 : vector<2x32xf32> to vector<2x1x32xf32>
    %7 = vector.broadcast %6 : vector<2x1x32xf32> to vector<2x8x32xf32>
    %8 = arith.addf %4, %7 : vector<2x8x32xf32>
    %9 = math.tanh %8 : vector<2x8x32xf32>
    %c0_6 = arith.constant 0 : index
    %c0_7 = arith.constant 0 : index
    %10 = vector.load %arg4[%c0_6, %c0_7] : memref<1x32xf32, #tpu.memory_space<vmem>>, vector<1x32xf32>
    %11 = vector.shape_cast %10 : vector<1x32xf32> to vector<1x1x32xf32>
    %12 = vector.broadcast %11 : vector<1x1x32xf32> to vector<2x8x32xf32>
    %13 = arith.mulf %9, %12 : vector<2x8x32xf32>
    %cst_8 = arith.constant dense<0.000000e+00> : vector<2x8xf32>
    %14 = vector.multi_reduction <add>, %13, %cst_8 [2] : vector<2x8x32xf32> to vector<2x8xf32>
    %cst_9 = arith.constant dense<0xFF800000> : vector<2xf32>
    %15 = vector.multi_reduction <maximumf>, %14, %cst_9 [1] : vector<2x8xf32> to vector<2xf32>
    %16 = vector.shape_cast %15 : vector<2xf32> to vector<2x1xf32>
    %17 = vector.broadcast %16 : vector<2x1xf32> to vector<2x8xf32>
    %18 = arith.subf %14, %17 : vector<2x8xf32>
    %19 = math.exp %18 : vector<2x8xf32>
    %cst_10 = arith.constant dense<0.000000e+00> : vector<2xf32>
    %20 = vector.multi_reduction <add>, %19, %cst_10 [1] : vector<2x8xf32> to vector<2xf32>
    %21 = vector.shape_cast %20 : vector<2xf32> to vector<2x1xf32>
    %22 = tpu.reciprocal %21 : vector<2x1xf32> -> vector<2x1xf32>
    %23 = vector.broadcast %22 : vector<2x1xf32> to vector<2x8xf32>
    %24 = arith.mulf %19, %23 : vector<2x8xf32>
    %c0_11 = arith.constant 0 : index
    %c0_12 = arith.constant 0 : index
    %25 = vector.load %arg5[%c0_11, %c0_12] : memref<2x8xf32, #tpu.memory_space<vmem>>, vector<2x8xf32>
    tpu.vector_store %arg5[%c0_11, %c0_12], %24 {strides = array<i32>} : memref<2x8xf32, #tpu.memory_space<vmem>>, vector<2x8xf32>,
    return
  }
  func.func @transform_0(%arg0: i32) -> (i32, i32, i32) {
    %c0_i32 = arith.constant 0 : i32
    %c0_i32_0 = arith.constant 0 : i32
    %c0_i32_1 = arith.constant 0 : i32
    return %arg0, %c0_i32, %c0_i32_0 : i32, i32, i32
  }
  func.func @transform_1(%arg0: i32) -> (i32, i32) {
    %c0_i32 = arith.constant 0 : i32
    %c0_i32_0 = arith.constant 0 : i32
    return %arg0, %c0_i32 : i32, i32
  }
  func.func @transform_2(%arg0: i32) -> (i32, i32) {
    %c0_i32 = arith.constant 0 : i32
    %c0_i32_0 = arith.constant 0 : i32
    %c0_i32_1 = arith.constant 0 : i32
    return %c0_i32, %c0_i32_0 : i32, i32
  }
  func.func @transform_3(%arg0: i32) -> (i32, i32) {
    %c0_i32 = arith.constant 0 : i32
    %c0_i32_0 = arith.constant 0 : i32
    %c0_i32_1 = arith.constant 0 : i32
    return %c0_i32, %c0_i32_0 : i32, i32
  }
  func.func @transform_4(%arg0: i32) -> (i32, i32) {
    %c0_i32 = arith.constant 0 : i32
    %c0_i32_0 = arith.constant 0 : i32
    return %arg0, %c0_i32 : i32, i32
  }
}

module attributes {stable_mosaic.version = 11 : i64} {
  func.func @_attention_kernel(%arg0: i32, %arg1: memref<2x8x32xf32, #tpu.memory_space<vmem>>, %arg2: memref<2x32xf32, #tpu.memory_space<vmem>>, %arg3: memref<32x32xf32, #tpu.memory_space<vmem>>, %arg4: memref<1x32xf32, #tpu.memory_space<vmem>>, %arg5: memref<2x8xf32, #tpu.memory_space<vmem>>) attributes {dimension_semantics = [#tpu.dimension_semantics<parallel>], iteration_bounds = array<i64: 1>, scalar_prefetch = 0 : i64, scratch_operands = 0 : i64, tpu.core_type = #tpu.core_type<tc>, window_params = [{transform_indices = @transform_0, window_bounds = array<i64: 2, 8, 32>}, {transform_indices = @transform_1, window_bounds = array<i64: 2, 32>}, {pipeline_mode = #tpu.pipeline_mode<synchronous>, transform_indices = @transform_2, window_bounds = array<i64: 32, 32>}, {pipeline_mode = #tpu.pipeline_mode<synchronous>, transform_indices = @transform_3, window_bounds = array<i64: 1, 32>}, {transform_indices = @transform_4, window_bounds = array<i64: 2, 8>}]} {
    %c0 = arith.constant 0 : index
    %c0_0 = arith.constant 0 : index
    %c0_1 = arith.constant 0 : index
    %0 = vector.load %arg1[%c0, %c0_0, %c0_1] : memref<2x8x32xf32, #tpu.memory_space<vmem>>, vector<2x8x32xf32>
    %1 = vector.shape_cast %0 : vector<2x8x32xf32> to vector<16x32xf32>
    %c0_2 = arith.constant 0 : index
    %c0_3 = arith.constant 0 : index
    %2 = vector.load %arg3[%c0_2, %c0_3] : memref<32x32xf32, #tpu.memory_space<vmem>>, vector<32x32xf32>
    %cst = arith.constant dense<0.000000e+00> : vector<16x32xf32>
    %3 = tpu.matmul %1, %2, %cst {dimension_numbers = #tpu.dot_dimension_numbers<[1], [0], [0], [1], [0, 0, 1, 1], [], []>} : vector<16x32xf32>, vector<32x32xf32>, vector<16x32xf32> -> vector<16x32xf32>
    %4 = vector.shape_cast %3 : vector<16x32xf32> to vector<2x8x32xf32>
    %c0_4 = arith.constant 0 : index
    %c0_5 = arith.constant 0 : index
    %5 = vector.load %arg2[%c0_4, %c0_5] : memref<2x32xf32, #tpu.memory_space<vmem>>, vector<2x32xf32>
    %6 = vector.shape_cast %5 : vector<2x32xf32> to vector<2x1x32xf32>
    %7 = vector.broadcast %6 : vector<2x1x32xf32> to vector<2x8x32xf32>
    %8 = arith.addf %4, %7 : vector<2x8x32xf32>
    %9 = math.tanh %8 : vector<2x8x32xf32>
    %c0_6 = arith.constant 0 : index
    %c0_7 = arith.constant 0 : index
    %10 = vector.load %arg4[%c0_6, %c0_7] : memref<1x32xf32, #tpu.memory_space<vmem>>, vector<1x32xf32>
    %11 = vector.shape_cast %10 : vector<1x32xf32> to vector<1x1x32xf32>
    %12 = vector.broadcast %11 : vector<1x1x32xf32> to vector<2x8x32xf32>
    %13 = arith.mulf %9, %12 : vector<2x8x32xf32>
    %cst_8 = arith.constant dense<0.000000e+00> : vector<2x8xf32>
    %14 = vector.multi_reduction <add>, %13, %cst_8 [2] : vector<2x8x32xf32> to vector<2x8xf32>
    %cst_9 = arith.constant dense<0xFF800000> : vector<2xf32>
    %15 = vector.multi_reduction <maximumf>, %14, %cst_9 [1] : vector<2x8xf32> to vector<2xf32>
    %16 = vector.shape_cast %15 : vector<2xf32> to vector<2x1xf32>
    %17 = vector.broadcast %16 : vector<2x1xf32> to vector<2x8xf32>
    %18 = arith.subf %14, %17 : vector<2x8xf32>
    %19 = math.exp %18 : vector<2x8xf32>
    %cst_10 = arith.constant dense<0.000000e+00> : vector<2xf32>
    %20 = vector.multi_reduction <add>, %19, %cst_10 [1] : vector<2x8xf32> to vector<2xf32>
    %21 = vector.shape_cast %20 : vector<2xf32> to vector<2x1xf32>
    %22 = tpu.reciprocal %21 : vector<2x1xf32> -> vector<2x1xf32>
    %23 = vector.broadcast %22 : vector<2x1xf32> to vector<2x8xf32>
    %24 = arith.mulf %19, %23 : vector<2x8xf32>
    %c0_11 = arith.constant 0 : index
    %c0_12 = arith.constant 0 : index
    %25 = vector.load %arg5[%c0_11, %c0_12] : memref<2x8xf32, #tpu.memory_space<vmem>>, vector<2x8xf32>
    tpu.vector_store %arg5[%c0_11, %c0_12], %24 {strides = array<i32>} : memref<2x8xf32, #tpu.memory_space<vmem>>, vector<2x8xf32>,
    return
  }
  func.func @transform_0(%arg0: i32) -> (i32, i32, i32) {
    %c0_i32 = arith.constant 0 : i32
    %c0_i32_0 = arith.constant 0 : i32
    %c0_i32_1 = arith.constant 0 : i32
    return %arg0, %c0_i32, %c0_i32_0 : i32, i32, i32
  }
  func.func @transform_1(%arg0: i32) -> (i32, i32) {
    %c0_i32 = arith.constant 0 : i32
    %c0_i32_0 = arith.constant 0 : i32
    return %arg0, %c0_i32 : i32, i32
  }
  func.func @transform_2(%arg0: i32) -> (i32, i32) {
    %c0_i32 = arith.constant 0 : i32
    %c0_i32_0 = arith.constant 0 : i32
    %c0_i32_1 = arith.constant 0 : i32
    return %c0_i32, %c0_i32_0 : i32, i32
  }
  func.func @transform_3(%arg0: i32) -> (i32, i32) {
    %c0_i32 = arith.constant 0 : i32
    %c0_i32_0 = arith.constant 0 : i32
    %c0_i32_1 = arith.constant 0 : i32
    return %c0_i32, %c0_i32_0 : i32, i32
  }
  func.func @transform_4(%arg0: i32) -> (i32, i32) {
    %c0_i32 = arith.constant 0 : i32
    %c0_i32_0 = arith.constant 0 : i32
    return %arg0, %c0_i32 : i32, i32
  }
}

</mosaic_0001>

<bundles_post_ra>
// kernel: tpu_custom_call.1
= control target key start
LH: loop header
LB: loop body
LE: loop exit
PB: predicated region body
PF: predicated region fallthrough
CT: control target
= control target key end

     0   :  { %9 = vsyncpa [#allocation3], 0  ;;  %s503_s0 = inlined_call_operand.hbm [shape: f32[2,8,32], index: 0, kind: input, shape index: {}]   ;;  %s504_s1 = inlined_call_operand.vmem [shape: f32[2,32], index: 1, kind: input, shape index: {}]   ;;  %s505_s2 = inlined_call_operand.hbm [shape: f32[32,32], index: 2, kind: input, shape index: {}]   ;;  %s506_s3 = inlined_call_operand.vmem [shape: f32[1,32], index: 3, kind: input, shape index: {}]   ;;  %s507_s4 = inlined_call_operand.hbm [shape: f32[2,8], index: 4, kind: output, shape index: {}]  }
   0x1   :  { %10 = vsyncpa [#allocation6], 0 }
   0x2   :  { %11 = vsyncpa [#allocation4], 0  ;;  %s413_s15 = smov [#allocation2]   ;;  %s341_s19 = scalar_lea.hbm %s503_s0, 256 }
   0x3   :  { %s17_s16 = sshll.u32 %s413_s15, 4  ;;  %p342_p0 = scmp.ne.s32.totalorder %s503_s0, %s341_s19  ;;  %s18_s16 = int_to_ptr.vmem [resolvable:$true] %s17_s16 }
   0x4   :  { %p345_p1 = scmp.lt.u32.totalorder %s341_s19, %s503_s0 }
   0x6   :  { %p347_p2 = pnand %p345_p1, %p342_p0 }
   0x8   :  { %350 = shalt.err (!%p347_p2)
}
   0x9   :  { %s351_s24 = scalar_lea.vmem %s18_s16, 256  ;;  %p356_p4 = scmp.lt.s32.totalorder %s18_s16, %s18_s16 }
   0xa   :  { %p352_p3 = scmp.ne.s32.totalorder %s18_s16, %s351_s24  ;;  %p357_p5 = scmp.lt.s32.totalorder %s351_s24, %s351_s24 }
   0xc   :  { %p358_p6 = por %p357_p5, %p356_p4 }
   0xe   :  { %p359_p7 = pnand %p358_p6, %p352_p3 }
  0x10   :  { %362 = shalt.err (!%p359_p7)
}
  0x11   :  { %s414_s25 = smov 128   ;;  %s415_s26 = smov 8  }
  0x12   :  { %23 = dma.hbm_to_vmem [thread:$0]  %s503_s0, 256, %s18_s16, [#allocation3], %s414_s25, %s414_s25, %s415_s26  }
  0x13   :  { %s416_s29 = smov [#allocation5]   ;;  %s363_s7 = scalar_lea.hbm %s505_s2, 512 }
  0x14   :  { %s31_s30 = sshll.u32 %s416_s29, 4  ;;  %p364_p8 = scmp.ne.s32.totalorder %s505_s2, %s363_s7  ;;  %s32_s30 = int_to_ptr.vmem [resolvable:$true] %s31_s30 }
  0x15   :  { %p367_p9 = scmp.lt.u32.totalorder %s363_s7, %s505_s2 }
  0x17   :  { %p369_p10 = pnand %p367_p9, %p364_p8 }
  0x19   :  { %372 = shalt.err (!%p369_p10)
}
  0x1a   :  { %s373_s12 = scalar_lea.vmem %s32_s30, 512  ;;  %p378_p12 = scmp.lt.s32.totalorder %s32_s30, %s32_s30 }
  0x1b   :  { %p374_p11 = scmp.ne.s32.totalorder %s32_s30, %s373_s12  ;;  %p379_p13 = scmp.lt.s32.totalorder %s373_s12, %s373_s12 }
  0x1d   :  { %p380_p0 = por %p379_p13, %p378_p12 }
  0x1f   :  { %p381_p1 = pnand %p380_p0, %p374_p11 }
  0x21   :  { %384 = shalt.err (!%p381_p1)
}
  0x22   :  { %37 = dma.hbm_to_vmem [thread:$0]  %s505_s2, 512, %s32_s30, [#allocation6], %s414_s25, %s414_s25, %s415_s26  }
  0x23   :  { %407 = dma.done.wait [#allocation3], 256  }
  0x24   :  { %408 = vsyncadd [#allocation3], 4294967040 }
  0x25   :  { %409 = dma.done.wait [#allocation6], 512  }
  0x26   :  { %410 = vsyncadd [#allocation6], 4294966784  ;;  %vm52_vm0 = vcmask 261120   ;;  %v48_v0 = vld [vmem:[#allocation5] sm:$0xff]  ;;  %v49_v1 = vld [vmem:[#allocation5 + $0x8] sm:$0xff]  ;;  %v147_v10 = vlaneseq  ;;  %vm199_vm1 = vcmask 1041409  }
  0x27   :  { %v50_v2 = vld [vmem:[#allocation5 + $0x10] sm:$0xff]  ;;  %v314_v3 = vpack.c.bf16 %v49_v1, %v48_v0  ;;  %v51_v4 = vld [vmem:[#allocation5 + $0x18] sm:$0xff]  ;;  %v417_v8 = vmov 1966171168   ;;  %vm202_vm2 = vcmask 58368   ;;  %v418_v40 = vmov 0  }
  0x28   :  { %v46_v5 = vld [vmem:[#allocation2] sm:$0xff]  ;;  %v318_v6 = vpack.c.bf16 %v51_v4, %v50_v2  ;;  %v47_v7 = vld [vmem:[#allocation2 + $0x8] sm:$0xff]  ;;  %v145_v9 = vunpack.c.l.s4 %v417_v8  ;;  %v471_v12 = vshrl.u32 %v147_v10, 7  ;;  %v190_v32 = vand.u32 127, %v147_v10  ;;  %330 = vset.pattern.permute.xlu0 %v418_v40  ;;  %329 = vset.pattern.permute.xlu1 %v418_v40 }
  0x29   :  { %311 = vmatprep.mubr.msk.f32.mxu0 %vm52_vm0, %v46_v5  ;;  %315 = vmatprep.subr.bf16.mxu0 %v314_v3  ;;  %v295_v13 = vld.sshfl [vmem:[%s504_s1] sm:$0x11 pattern:$0x75316420]  ;;  %s419_s1 = smov [#allocation7]  }
  0x2a   :  { %317 = vmatpush3.bf16.msra.mxu0 %v314_v3  ;;  %v146_v11 = vunpack.c.0.s8 %v145_v9  ;;  %v143_v14 = vcombine.high %v295_v13, %v295_v13  ;;  %v160_v17 = vsub.s32 0, %v471_v12  ;;  %v296_v25 = vld [vmem:[%s506_s3] ss:$0 sm:$0xff]  ;;  %v193_v34 = vsub.s32 %v190_v32, %v471_v12  ;;  %s283_s3 = sshll.u32 %s419_s1, 4  ;;  %s284_s3 = int_to_ptr.vmem [resolvable:$true] %s283_s3 }
  0x2b   :  { %319 = vmatprep.subr.bf16.mxu0 %v318_v6  ;;  %v213_v41 = vsub.s32 1, %v471_v12  ;;  %s385_s17 = scalar_lea.vmem %s284_s3, 32  ;;  %p390_p3 = scmp.lt.s32.totalorder %s284_s3, %s284_s3 }
  0x2c   :  { %v149_v15 = vsub.s32 %v146_v11, %v471_v12  ;;  %p386_p2 = scmp.ne.s32.totalorder %s284_s3, %s385_s17  ;;  %p391_p4 = scmp.lt.s32.totalorder %s385_s17, %s385_s17 }
  0x2e   :  { %321 = vmatpush3.bf16.msra.mxu0 %v318_v6  ;;  %v157_v16 = vrot.slane %v143_v14, %v149_v15  ;;  %v150_v18 = vrot.slane %v295_v13, %v149_v15  ;;  %p392_p5 = por %p391_p4, %p390_p3 }
  0x30   :  { %v165_v19 = vrot.slane %v157_v16, %v160_v17  ;;  %v161_v20 = vrot.slane %v150_v18, %v160_v17  ;;  %p393_p6 = pnand %p392_p5, %p386_p2 }
  0x31   :  { %312 = vmatmul.mubr.msk.f32.vlgmr.msra.gmra.mrb[0].mxu0 %vm52_vm0, %v47_v7 }
 0x104   :  { %v313_v21 = vpop.f32.mrb[0].mxu0 }
 0x105   :  { %v169_v22 = vadd.f32 %v313_v21, %v165_v19  ;;  %v125_v23 = vpop.f32.mrb[1].mxu0 }
 0x106   :  { %v168_v24 = vadd.f32 %v161_v20, %v125_v23 }
 0x107   :  { %331 = vtanh.f32 %v169_v22 }
 0x108   :  { %333 = vtanh.f32 %v168_v24 }
 0x111   :  { %v332_v26 = vpop.eup %331 }
 0x112   :  { %v334_v27 = vpop.eup %333  ;;  %v180_v30 = vmul.f32 %v332_v26, %v296_v25 }
 0x113   :  { %v179_v28 = vmul.f32 %v334_v27, %v296_v25 }
 0x114   :  { %v184_v31 = vsel %vm52_vm0, %v180_v30, 0.0 }
 0x115   :  { %v181_v29 = vsel %vm52_vm0, %v179_v28, 0.0 }
 0x116   :  { %182 = vadd.xlane.f32.xlu0 %v181_v29 }
 0x11a   :  { %185 = vadd.xlane.f32.xlu0 %v184_v31 }
 0x1a3   :  { %v183_v33 = vpop.xlane.xlu0 %182 }
 0x1a4   :  { %v194_v36 = vrot.slane %v183_v33, %v193_v34 }
 0x1a7   :  { %v186_v35 = vpop.xlane.xlu0 %185 }
 0x1a8   :  { %v198_v37 = vrot.slane %v186_v35, %v193_v34 }
 0x1aa   :  { %v200_v38 = vsel %vm199_vm1, %v198_v37, %v194_v36 }
 0x1ab   :  { %v203_v39 = vsel %vm202_vm2, %v200_v38, -inf }
 0x1ac   :  { %204 = vmax.xlane.f32.xlu1 %v203_v39 }
 0x239   :  { %v205_v42 = vpop.xlane.xlu1 %204 }
 0x23a   :  { %v210_v43 = vrot.slane %v205_v42, %v160_v17  ;;  %v214_v44 = vrot.slane %v205_v42, %v213_v41 }
 0x23c   :  { %v217_v45 = vsub.f32 %v183_v33, %v210_v43  ;;  %v218_v46 = vsub.f32 %v186_v35, %v214_v44 }
 0x23e   :  { %v219_v47 = vmul.f32 1.442695, %v217_v45  ;;  %v221_v48 = vmul.f32 1.442695, %v218_v46 }
 0x240   :  { %335 = vpow2.f32 %v219_v47 }
 0x241   :  { %337 = vpow2.f32 %v221_v48 }
 0x24a   :  { %v336_v49 = vpop.eup %335 }
 0x24b   :  { %v338_v50 = vpop.eup %337  ;;  %226 = vperm.xlu1 %329, %v336_v49  }
 0x24c   :  { %229 = vperm.xlu0 %330, %v338_v50  }
 0x2ca   :  { %v227_v51 = vpop.permute.xlu1 %226 }
 0x2cb   :  { %v230_v52 = vpop.permute.xlu0 %229  ;;  %v234_v53 = vrot.slane %v227_v51, %v193_v34 }
 0x2cc   :  { %v238_v54 = vrot.slane %v230_v52, %v193_v34 }
 0x2ce   :  { %v239_v55 = vsel %vm199_vm1, %v238_v54, %v234_v53 }
 0x2cf   :  { %v241_v56 = vsel %vm202_vm2, %v239_v55, 0.0 }
 0x2d0   :  { %242 = vadd.xlane.f32.xlu1 %v241_v56 }
 0x35d   :  { %v243_v57 = vpop.xlane.xlu1 %242 }
 0x35e   :  { %339 = vrcp.f32 %v243_v57 }
 0x368   :  { %v340_v58 = vpop.eup %339 }
 0x369   :  { %v249_v59 = vrot.slane %v340_v58, %v160_v17  ;;  %v253_v61 = vrot.slane %v340_v58, %v213_v41 }
 0x36b   :  { %v256_v60 = vmul.f32 %v336_v49, %v249_v59  ;;  %v257_v62 = vmul.f32 %v338_v50, %v253_v61 }
 0x36d   :  { %261 = vperm.xlu0 %330, %v256_v60  }
 0x371   :  { %264 = vperm.xlu0 %330, %v257_v62  }
 0x3ec   :  { %v262_v63 = vpop.permute.xlu0 %261 }
 0x3ed   :  { %v269_v1 = vrot.slane %v262_v63, %v193_v34 }
 0x3f0   :  { %v265_v0 = vpop.permute.xlu0 %264 }
 0x3f1   :  { %v273_v2 = vrot.slane %v265_v0, %v193_v34 }
 0x3f3   :  { %v274_v3 = vsel %vm199_vm1, %v273_v2, %v269_v1 }
 0x3f4   :  { %276 = vst.msk [vmem:[#allocation7] sm:$0x3] %vm202_vm2, %v274_v3 }
 0x3f5   :  { %396 = shalt.err (!%p393_p6)
}
 0x3f6   :  { %s397_s20 = scalar_lea.hbm %s507_s4, 32 }
 0x3f7   :  { %p398_p7 = scmp.ne.s32.totalorder %s507_s4, %s397_s20  ;;  %p401_p8 = scmp.lt.u32.totalorder %s397_s20, %s507_s4 }
 0x3f9   :  { %p403_p9 = pnand %p401_p8, %p398_p7 }
 0x3fb   :  { %406 = shalt.err (!%p403_p9)
}
 0x3fc   :  { %286 = dma.vmem_to_hbm [thread:$0]  %s284_s3, 32, %s507_s4, [#allocation4]  }
 0x3fd   :  { %411 = dma.done.wait [#allocation4], 32  }
 0x3fe   :  { %412 = vsyncadd [#allocation4], 4294967264 }
 0x3ff   :  { %290 = vsyncpa [#allocation3], 1 }
 0x400   :  { %291 = vsyncpa [#allocation6], 1 }
 0x401   :  { %292 = vsyncpa [#allocation4], 1 }

// kernel: tpu_custom_call.1
= control target key start
LH: loop header
LB: loop body
LE: loop exit
PB: predicated region body
PF: predicated region fallthrough
CT: control target
= control target key end

     0   :  { %9 = vsyncpa [#allocation3], 0  ;;  %s503_s0 = inlined_call_operand.hbm [shape: f32[2,8,32], index: 0, kind: input, shape index: {}]   ;;  %s504_s1 = inlined_call_operand.vmem [shape: f32[2,32], index: 1, kind: input, shape index: {}]   ;;  %s505_s2 = inlined_call_operand.hbm [shape: f32[32,32], index: 2, kind: input, shape index: {}]   ;;  %s506_s3 = inlined_call_operand.vmem [shape: f32[1,32], index: 3, kind: input, shape index: {}]   ;;  %s507_s4 = inlined_call_operand.hbm [shape: f32[2,8], index: 4, kind: output, shape index: {}]  }
   0x1   :  { %10 = vsyncpa [#allocation6], 0 }
   0x2   :  { %11 = vsyncpa [#allocation4], 0  ;;  %s413_s15 = smov [#allocation2]   ;;  %s341_s19 = scalar_lea.hbm %s503_s0, 256 }
   0x3   :  { %s17_s16 = sshll.u32 %s413_s15, 4  ;;  %p342_p0 = scmp.ne.s32.totalorder %s503_s0, %s341_s19  ;;  %s18_s16 = int_to_ptr.vmem [resolvable:$true] %s17_s16 }
   0x4   :  { %p345_p1 = scmp.lt.u32.totalorder %s341_s19, %s503_s0 }
   0x6   :  { %p347_p2 = pnand %p345_p1, %p342_p0 }
   0x8   :  { %350 = shalt.err (!%p347_p2)
}
   0x9   :  { %s351_s24 = scalar_lea.vmem %s18_s16, 256  ;;  %p356_p4 = scmp.lt.s32.totalorder %s18_s16, %s18_s16 }
   0xa   :  { %p352_p3 = scmp.ne.s32.totalorder %s18_s16, %s351_s24  ;;  %p357_p5 = scmp.lt.s32.totalorder %s351_s24, %s351_s24 }
   0xc   :  { %p358_p6 = por %p357_p5, %p356_p4 }
   0xe   :  { %p359_p7 = pnand %p358_p6, %p352_p3 }
  0x10   :  { %362 = shalt.err (!%p359_p7)
}
  0x11   :  { %s414_s25 = smov 128   ;;  %s415_s26 = smov 8  }
  0x12   :  { %23 = dma.hbm_to_vmem [thread:$0]  %s503_s0, 256, %s18_s16, [#allocation3], %s414_s25, %s414_s25, %s415_s26  }
  0x13   :  { %s416_s29 = smov [#allocation5]   ;;  %s363_s7 = scalar_lea.hbm %s505_s2, 512 }
  0x14   :  { %s31_s30 = sshll.u32 %s416_s29, 4  ;;  %p364_p8 = scmp.ne.s32.totalorder %s505_s2, %s363_s7  ;;  %s32_s30 = int_to_ptr.vmem [resolvable:$true] %s31_s30 }
  0x15   :  { %p367_p9 = scmp.lt.u32.totalorder %s363_s7, %s505_s2 }
  0x17   :  { %p369_p10 = pnand %p367_p9, %p364_p8 }
  0x19   :  { %372 = shalt.err (!%p369_p10)
}
  0x1a   :  { %s373_s12 = scalar_lea.vmem %s32_s30, 512  ;;  %p378_p12 = scmp.lt.s32.totalorder %s32_s30, %s32_s30 }
  0x1b   :  { %p374_p11 = scmp.ne.s32.totalorder %s32_s30, %s373_s12  ;;  %p379_p13 = scmp.lt.s32.totalorder %s373_s12, %s373_s12 }
  0x1d   :  { %p380_p0 = por %p379_p13, %p378_p12 }
  0x1f   :  { %p381_p1 = pnand %p380_p0, %p374_p11 }
  0x21   :  { %384 = shalt.err (!%p381_p1)
}
  0x22   :  { %37 = dma.hbm_to_vmem [thread:$0]  %s505_s2, 512, %s32_s30, [#allocation6], %s414_s25, %s414_s25, %s415_s26  }
  0x23   :  { %407 = dma.done.wait [#allocation3], 256  }
  0x24   :  { %408 = vsyncadd [#allocation3], 4294967040 }
  0x25   :  { %409 = dma.done.wait [#allocation6], 512  }
  0x26   :  { %410 = vsyncadd [#allocation6], 4294966784  ;;  %vm52_vm0 = vcmask 261120   ;;  %v48_v0 = vld [vmem:[#allocation5] sm:$0xff]  ;;  %v49_v1 = vld [vmem:[#allocation5 + $0x8] sm:$0xff]  ;;  %v147_v10 = vlaneseq  ;;  %vm199_vm1 = vcmask 1041409  }
  0x27   :  { %v50_v2 = vld [vmem:[#allocation5 + $0x10] sm:$0xff]  ;;  %v314_v3 = vpack.c.bf16 %v49_v1, %v48_v0  ;;  %v51_v4 = vld [vmem:[#allocation5 + $0x18] sm:$0xff]  ;;  %v417_v8 = vmov 1966171168   ;;  %vm202_vm2 = vcmask 58368   ;;  %v418_v40 = vmov 0  }
  0x28   :  { %v46_v5 = vld [vmem:[#allocation2] sm:$0xff]  ;;  %v318_v6 = vpack.c.bf16 %v51_v4, %v50_v2  ;;  %v47_v7 = vld [vmem:[#allocation2 + $0x8] sm:$0xff]  ;;  %v145_v9 = vunpack.c.l.s4 %v417_v8  ;;  %v471_v12 = vshrl.u32 %v147_v10, 7  ;;  %v190_v32 = vand.u32 127, %v147_v10  ;;  %330 = vset.pattern.permute.xlu0 %v418_v40  ;;  %329 = vset.pattern.permute.xlu1 %v418_v40 }
  0x29   :  { %311 = vmatprep.mubr.msk.f32.mxu0 %vm52_vm0, %v46_v5  ;;  %315 = vmatprep.subr.bf16.mxu0 %v314_v3  ;;  %v295_v13 = vld.sshfl [vmem:[%s504_s1] sm:$0x11 pattern:$0x75316420]  ;;  %s419_s1 = smov [#allocation7]  }
  0x2a   :  { %317 = vmatpush3.bf16.msra.mxu0 %v314_v3  ;;  %v146_v11 = vunpack.c.0.s8 %v145_v9  ;;  %v143_v14 = vcombine.high %v295_v13, %v295_v13  ;;  %v160_v17 = vsub.s32 0, %v471_v12  ;;  %v296_v25 = vld [vmem:[%s506_s3] ss:$0 sm:$0xff]  ;;  %v193_v34 = vsub.s32 %v190_v32, %v471_v12  ;;  %s283_s3 = sshll.u32 %s419_s1, 4  ;;  %s284_s3 = int_to_ptr.vmem [resolvable:$true] %s283_s3 }
  0x2b   :  { %319 = vmatprep.subr.bf16.mxu0 %v318_v6  ;;  %v213_v41 = vsub.s32 1, %v471_v12  ;;  %s385_s17 = scalar_lea.vmem %s284_s3, 32  ;;  %p390_p3 = scmp.lt.s32.totalorder %s284_s3, %s284_s3 }
  0x2c   :  { %v149_v15 = vsub.s32 %v146_v11, %v471_v12  ;;  %p386_p2 = scmp.ne.s32.totalorder %s284_s3, %s385_s17  ;;  %p391_p4 = scmp.lt.s32.totalorder %s385_s17, %s385_s17 }
  0x2e   :  { %321 = vmatpush3.bf16.msra.mxu0 %v318_v6  ;;  %v157_v16 = vrot.slane %v143_v14, %v149_v15  ;;  %v150_v18 = vrot.slane %v295_v13, %v149_v15  ;;  %p392_p5 = por %p391_p4, %p390_p3 }
  0x30   :  { %v165_v19 = vrot.slane %v157_v16, %v160_v17  ;;  %v161_v20 = vrot.slane %v150_v18, %v160_v17  ;;  %p393_p6 = pnand %p392_p5, %p386_p2 }
  0x31   :  { %312 = vmatmul.mubr.msk.f32.vlgmr.msra.gmra.mrb[0].mxu0 %vm52_vm0, %v47_v7 }
 0x104   :  { %v313_v21 = vpop.f32.mrb[0].mxu0 }
 0x105   :  { %v169_v22 = vadd.f32 %v313_v21, %v165_v19  ;;  %v125_v23 = vpop.f32.mrb[1].mxu0 }
 0x106   :  { %v168_v24 = vadd.f32 %v161_v20, %v125_v23 }
 0x107   :  { %331 = vtanh.f32 %v169_v22 }
 0x108   :  { %333 = vtanh.f32 %v168_v24 }
 0x111   :  { %v332_v26 = vpop.eup %331 }
 0x112   :  { %v334_v27 = vpop.eup %333  ;;  %v180_v30 = vmul.f32 %v332_v26, %v296_v25 }
 0x113   :  { %v179_v28 = vmul.f32 %v334_v27, %v296_v25 }
 0x114   :  { %v184_v31 = vsel %vm52_vm0, %v180_v30, 0.0 }
 0x115   :  { %v181_v29 = vsel %vm52_vm0, %v179_v28, 0.0 }
 0x116   :  { %182 = vadd.xlane.f32.xlu0 %v181_v29 }
 0x11a   :  { %185 = vadd.xlane.f32.xlu0 %v184_v31 }
 0x1a3   :  { %v183_v33 = vpop.xlane.xlu0 %182 }
 0x1a4   :  { %v194_v36 = vrot.slane %v183_v33, %v193_v34 }
 0x1a7   :  { %v186_v35 = vpop.xlane.xlu0 %185 }
 0x1a8   :  { %v198_v37 = vrot.slane %v186_v35, %v193_v34 }
 0x1aa   :  { %v200_v38 = vsel %vm199_vm1, %v198_v37, %v194_v36 }
 0x1ab   :  { %v203_v39 = vsel %vm202_vm2, %v200_v38, -inf }
 0x1ac   :  { %204 = vmax.xlane.f32.xlu1 %v203_v39 }
 0x239   :  { %v205_v42 = vpop.xlane.xlu1 %204 }
 0x23a   :  { %v210_v43 = vrot.slane %v205_v42, %v160_v17  ;;  %v214_v44 = vrot.slane %v205_v42, %v213_v41 }
 0x23c   :  { %v217_v45 = vsub.f32 %v183_v33, %v210_v43  ;;  %v218_v46 = vsub.f32 %v186_v35, %v214_v44 }
 0x23e   :  { %v219_v47 = vmul.f32 1.442695, %v217_v45  ;;  %v221_v48 = vmul.f32 1.442695, %v218_v46 }
 0x240   :  { %335 = vpow2.f32 %v219_v47 }
 0x241   :  { %337 = vpow2.f32 %v221_v48 }
 0x24a   :  { %v336_v49 = vpop.eup %335 }
 0x24b   :  { %v338_v50 = vpop.eup %337  ;;  %226 = vperm.xlu1 %329, %v336_v49  }
 0x24c   :  { %229 = vperm.xlu0 %330, %v338_v50  }
 0x2ca   :  { %v227_v51 = vpop.permute.xlu1 %226 }
 0x2cb   :  { %v230_v52 = vpop.permute.xlu0 %229  ;;  %v234_v53 = vrot.slane %v227_v51, %v193_v34 }
 0x2cc   :  { %v238_v54 = vrot.slane %v230_v52, %v193_v34 }
 0x2ce   :  { %v239_v55 = vsel %vm199_vm1, %v238_v54, %v234_v53 }
 0x2cf   :  { %v241_v56 = vsel %vm202_vm2, %v239_v55, 0.0 }
 0x2d0   :  { %242 = vadd.xlane.f32.xlu1 %v241_v56 }
 0x35d   :  { %v243_v57 = vpop.xlane.xlu1 %242 }
 0x35e   :  { %339 = vrcp.f32 %v243_v57 }
 0x368   :  { %v340_v58 = vpop.eup %339 }
 0x369   :  { %v249_v59 = vrot.slane %v340_v58, %v160_v17  ;;  %v253_v61 = vrot.slane %v340_v58, %v213_v41 }
 0x36b   :  { %v256_v60 = vmul.f32 %v336_v49, %v249_v59  ;;  %v257_v62 = vmul.f32 %v338_v50, %v253_v61 }
 0x36d   :  { %261 = vperm.xlu0 %330, %v256_v60  }
 0x371   :  { %264 = vperm.xlu0 %330, %v257_v62  }
 0x3ec   :  { %v262_v63 = vpop.permute.xlu0 %261 }
 0x3ed   :  { %v269_v1 = vrot.slane %v262_v63, %v193_v34 }
 0x3f0   :  { %v265_v0 = vpop.permute.xlu0 %264 }
 0x3f1   :  { %v273_v2 = vrot.slane %v265_v0, %v193_v34 }
 0x3f3   :  { %v274_v3 = vsel %vm199_vm1, %v273_v2, %v269_v1 }
 0x3f4   :  { %276 = vst.msk [vmem:[#allocation7] sm:$0x3] %vm202_vm2, %v274_v3 }
 0x3f5   :  { %396 = shalt.err (!%p393_p6)
}
 0x3f6   :  { %s397_s20 = scalar_lea.hbm %s507_s4, 32 }
 0x3f7   :  { %p398_p7 = scmp.ne.s32.totalorder %s507_s4, %s397_s20  ;;  %p401_p8 = scmp.lt.u32.totalorder %s397_s20, %s507_s4 }
 0x3f9   :  { %p403_p9 = pnand %p401_p8, %p398_p7 }
 0x3fb   :  { %406 = shalt.err (!%p403_p9)
}
 0x3fc   :  { %286 = dma.vmem_to_hbm [thread:$0]  %s284_s3, 32, %s507_s4, [#allocation4]  }
 0x3fd   :  { %411 = dma.done.wait [#allocation4], 32  }
 0x3fe   :  { %412 = vsyncadd [#allocation4], 4294967264 }
 0x3ff   :  { %290 = vsyncpa [#allocation3], 1 }
 0x400   :  { %291 = vsyncpa [#allocation6], 1 }
 0x401   :  { %292 = vsyncpa [#allocation4], 1 }

</bundles_post_ra>
